<compile_context>
chip_gen: v6e
topology: v6e:2x2x1
jax: 0.10.0
libtpu: 0.0.40
codegen_flags: <defaults>
</compile_context>

<pallas_src>
import jax
import jax.numpy as jnp
from jax.experimental import pallas as pl
from jax.experimental.pallas import tpu as pltpu


def channel_attention_kernel(x_ref, w1_ref, w2_ref, o_ref):
    # x_ref block: (Bblk, C, HW) f32
    x = x_ref[...]
    bblk = x.shape[0]

    # ---- AdaptiveAvgPool2d(1) / AdaptiveMaxPool2d(1): lane-axis reductions ----
    avg = jnp.mean(x, axis=-1)           # (Bblk, C)
    mx = jnp.max(x, axis=-1)             # (Bblk, C)

    # ---- shared MLP: run both pooled vectors through fc1/relu/fc2 in one pass ----
    pooled = jnp.concatenate([avg, mx], axis=0)                        # (2*Bblk, C)
    h = jnp.dot(pooled, w1_ref[...], preferred_element_type=jnp.float32)
    h = jnp.maximum(h, 0.0)                                            # (2*Bblk, hidden)
    s = jnp.dot(h, w2_ref[...], preferred_element_type=jnp.float32)    # (2*Bblk, C)

    # ---- combine branches + sigmoid ----
    att = jax.nn.sigmoid(s[:bblk] + s[bblk:])                          # (Bblk, C)
    o_ref[...] = att[:, None, :]                                       # (Bblk, 1, C)


def _choose_batch_block(B, C, HW, tile_budget_bytes):
    """Largest divisor of B whose x-tile fits the VMEM budget; keep >=2 grid
    steps (for v7x's 2 TensorCores) when there is enough work to split."""
    per_b = C * HW * 4  # f32 bytes of the x tile per batch element
    best = 1
    for d in range(1, B + 1):
        if B % d == 0 and d * per_b <= tile_budget_bytes:
            best = d
    if best == B and B >= 4 and B % 2 == 0 and B * per_b > (1 << 20):
        best = B // 2
    return best


def channel_attention(x, w1, w2, *, tile_budget_bytes=6 * 1024 * 1024):
    """x: [B, C, H, W] f32.  w1: [C, hidden], w2: [hidden, C]
    (1x1-conv weights, bias-free, already transposed for x @ W usage)."""
    B, C, H, W = x.shape
    HW = H * W
    hidden = w1.shape[1]
    x2 = x.reshape(B, C, HW)

    bblk = _choose_batch_block(B, C, HW, tile_budget_bytes)
    tile_bytes = bblk * C * HW * 4
    vmem_limit = None
    if tile_bytes > tile_budget_bytes:
        # A single batch element alone exceeds the budget: raise the scoped limit.
        # TODO(synk): for very large C*H*W, tile the spatial axis instead and
        # accumulate the avg/max statistics in a scratch accumulator.
        vmem_limit = 2 * tile_bytes + (2 << 20)

    out = pl.pallas_call(
        channel_attention_kernel,
        out_shape=jax.ShapeDtypeStruct((B, 1, C), jnp.float32),
        grid_spec=pltpu.PrefetchScalarGridSpec(
            num_scalar_prefetch=0,
            grid=(B // bblk,),
            in_specs=[
                pl.BlockSpec((bblk, C, HW), lambda b: (b, 0, 0)),
                pl.BlockSpec((C, hidden), lambda b: (0, 0)),
                pl.BlockSpec((hidden, C), lambda b: (0, 0)),
            ],
            out_specs=pl.BlockSpec((bblk, 1, C), lambda b: (b, 0, 0)),
        ),
        compiler_params=pltpu.CompilerParams(
            dimension_semantics=("parallel",),
            vmem_limit_bytes=vmem_limit,
        ),
    )(x2, w1, w2)
    return out.reshape(B, C, 1, 1)


def init_params(key, in_planes, ratio):
    """Deterministic bias-free 1x1-conv init (uniform +/- 1/sqrt(fan_in)),
    stored transposed for x @ W usage."""
    hidden = in_planes // ratio
    assert hidden >= 1, "in_planes // ratio must be >= 1"
    k1, k2 = jax.random.split(key)
    bound1 = 1.0 / (in_planes ** 0.5)
    bound2 = 1.0 / (hidden ** 0.5)
    w1 = jax.random.uniform(k1, (in_planes, hidden), jnp.float32, -bound1, bound1)
    w2 = jax.random.uniform(k2, (hidden, in_planes), jnp.float32, -bound2, bound2)
    return w1, w2


def channel_attention_ref(x, w1, w2):
    """Pure-JAX reference of the PyTorch ChannelAttention.forward."""
    avg = jnp.mean(x, axis=(2, 3))                      # (B, C)
    mx = jnp.max(x, axis=(2, 3))                        # (B, C)
    a = jnp.maximum(avg @ w1, 0.0) @ w2
    m = jnp.maximum(mx @ w1, 0.0) @ w2
    return jax.nn.sigmoid(a + m)[:, :, None, None]      # (B, C, 1, 1)


if __name__ == "__main__":
    key = jax.random.PRNGKey(0)
    kx, kp = jax.random.split(key)

    B, C, H, W = 2, 4, 16, 16
    ratio = 2  # module default is 8, but in_planes // ratio must be >= 1 at C=4

    x = jax.random.normal(kx, (B, C, H, W), dtype=jnp.float32)
    w1, w2 = init_params(kp, C, ratio)

    out = jax.block_until_ready(channel_attention(x, w1, w2))
    ref = channel_attention_ref(x, w1, w2)

    assert out.shape == (B, C, 1, 1)
    assert jnp.allclose(out, ref, atol=1e-5, rtol=1e-5)

    print("KERNEL_OK")
</pallas_src>

<mosaic_0001>
module attributes {stable_mosaic.version = 11 : i64} {
  func.func @channel_attention_kernel(%arg0: i32, %arg1: memref<2x4x256xf32, #tpu.memory_space<vmem>>, %arg2: memref<4x2xf32, #tpu.memory_space<vmem>>, %arg3: memref<2x4xf32, #tpu.memory_space<vmem>>, %arg4: memref<2x1x4xf32, #tpu.memory_space<vmem>>) attributes {dimension_semantics = [#tpu.dimension_semantics<parallel>], iteration_bounds = array<i64: 1>, scalar_prefetch = 0 : i64, scratch_operands = 0 : i64, tpu.core_type = #tpu.core_type<tc>, window_params = [{transform_indices = @transform_0, window_bounds = array<i64: 2, 4, 256>}, {pipeline_mode = #tpu.pipeline_mode<synchronous>, transform_indices = @transform_1, window_bounds = array<i64: 4, 2>}, {pipeline_mode = #tpu.pipeline_mode<synchronous>, transform_indices = @transform_2, window_bounds = array<i64: 2, 4>}, {transform_indices = @transform_3, window_bounds = array<i64: 2, 1, 4>}]} {
    %c0 = arith.constant 0 : index
    %c0_0 = arith.constant 0 : index
    %c0_1 = arith.constant 0 : index
    %0 = vector.load %arg1[%c0, %c0_0, %c0_1] : memref<2x4x256xf32, #tpu.memory_space<vmem>>, vector<2x4x256xf32>
    %cst = arith.constant dense<0.000000e+00> : vector<2x4xf32>
    %1 = vector.multi_reduction <add>, %0, %cst [2] : vector<2x4x256xf32> to vector<2x4xf32>
    %cst_2 = arith.constant 2.560000e+02 : f32
    %2 = vector.broadcast %cst_2 : f32 to vector<2x4xf32>
    %3 = arith.divf %1, %2 : vector<2x4xf32>
    %cst_3 = arith.constant dense<0xFF800000> : vector<2x4xf32>
    %4 = vector.multi_reduction <maximumf>, %0, %cst_3 [2] : vector<2x4x256xf32> to vector<2x4xf32>
    %5 = tpu.concatenate %3, %4 in 0 : vector<2x4xf32>, vector<2x4xf32> -> vector<4x4xf32>
    %c0_4 = arith.constant 0 : index
    %c0_5 = arith.constant 0 : index
    %6 = vector.load %arg2[%c0_4, %c0_5] : memref<4x2xf32, #tpu.memory_space<vmem>>, vector<4x2xf32>
    %cst_6 = arith.constant dense<0.000000e+00> : vector<4x2xf32>
    %7 = tpu.matmul %5, %6, %cst_6 {dimension_numbers = #tpu.dot_dimension_numbers<[1], [0], [0], [1], [0, 0, 1, 1], [], []>} : vector<4x4xf32>, vector<4x2xf32>, vector<4x2xf32> -> vector<4x2xf32>
    %cst_7 = arith.constant 0.000000e+00 : f32
    %8 = vector.broadcast %cst_7 : f32 to vector<4x2xf32>
    %9 = arith.maximumf %7, %8 : vector<4x2xf32>
    %c0_8 = arith.constant 0 : index
    %c0_9 = arith.constant 0 : index
    %10 = vector.load %arg3[%c0_8, %c0_9] : memref<2x4xf32, #tpu.memory_space<vmem>>, vector<2x4xf32>
    %cst_10 = arith.constant dense<0.000000e+00> : vector<4x4xf32>
    %11 = tpu.matmul %9, %10, %cst_10 {dimension_numbers = #tpu.dot_dimension_numbers<[1], [0], [0], [1], [0, 0, 1, 1], [], []>} : vector<4x2xf32>, vector<2x4xf32>, vector<4x4xf32> -> vector<4x4xf32>
    %12 = vector.extract_strided_slice %11 {offsets = [0, 0], sizes = [2, 4], strides = [1, 1]} : vector<4x4xf32> to vector<2x4xf32>
    %13 = vector.extract_strided_slice %11 {offsets = [2, 0], sizes = [2, 4], strides = [1, 1]} : vector<4x4xf32> to vector<2x4xf32>
    %14 = arith.addf %12, %13 : vector<2x4xf32>
    %15 = arith.negf %14 : vector<2x4xf32>
    %16 = math.exp %15 : vector<2x4xf32>
    %cst_11 = arith.constant 1.000000e+00 : f32
    %17 = vector.broadcast %cst_11 : f32 to vector<2x4xf32>
    %18 = arith.addf %17, %16 : vector<2x4xf32>
    %19 = arith.divf %17, %18 : vector<2x4xf32>
    %20 = vector.shape_cast %19 : vector<2x4xf32> to vector<2x1x4xf32>
    %c0_12 = arith.constant 0 : index
    %c0_13 = arith.constant 0 : index
    %c0_14 = arith.constant 0 : index
    %21 = vector.load %arg4[%c0_12, %c0_13, %c0_14] : memref<2x1x4xf32, #tpu.memory_space<vmem>>, vector<2x1x4xf32>
    tpu.vector_store %arg4[%c0_12, %c0_13, %c0_14], %20 {strides = array<i32>} : memref<2x1x4xf32, #tpu.memory_space<vmem>>, vector<2x1x4xf32>,
    return
  }
  func.func @transform_0(%arg0: i32) -> (i32, i32, i32) {
    %c0_i32 = arith.constant 0 : i32
    %c0_i32_0 = arith.constant 0 : i32
    %c0_i32_1 = arith.constant 0 : i32
    return %arg0, %c0_i32, %c0_i32_0 : i32, i32, i32
  }
  func.func @transform_1(%arg0: i32) -> (i32, i32) {
    %c0_i32 = arith.constant 0 : i32
    %c0_i32_0 = arith.constant 0 : i32
    %c0_i32_1 = arith.constant 0 : i32
    return %c0_i32, %c0_i32_0 : i32, i32
  }
  func.func @transform_2(%arg0: i32) -> (i32, i32) {
    %c0_i32 = arith.constant 0 : i32
    %c0_i32_0 = arith.constant 0 : i32
    %c0_i32_1 = arith.constant 0 : i32
    return %c0_i32, %c0_i32_0 : i32, i32
  }
  func.func @transform_3(%arg0: i32) -> (i32, i32, i32) {
    %c0_i32 = arith.constant 0 : i32
    %c0_i32_0 = arith.constant 0 : i32
    %c0_i32_1 = arith.constant 0 : i32
    return %arg0, %c0_i32, %c0_i32_0 : i32, i32, i32
  }
}

</mosaic_0001>

<bundles_post_ra>
// kernel: tpu_custom_call.1
= control target key start
LH: loop header
LB: loop body
LE: loop exit
PB: predicated region body
PF: predicated region fallthrough
CT: control target
= control target key end

     0   :  { %8 = vsyncpa [#allocation3], 0  ;;  %s431_s0 = inlined_call_operand.hbm [shape: f32[2,4,256], index: 0, kind: input, shape index: {}]   ;;  %s432_s1 = inlined_call_operand.vmem [shape: f32[4,2], index: 1, kind: input, shape index: {}]   ;;  %s433_s2 = inlined_call_operand.vmem [shape: f32[2,4], index: 2, kind: input, shape index: {}]   ;;  %s434_s3 = inlined_call_operand.hbm [shape: f32[2,1,4], index: 3, kind: output, shape index: {}]  }
   0x1   :  { %9 = vsyncpa [#allocation4], 0  ;;  %s381_s12 = smov [#allocation2]  }
   0x2   :  { %s15_s13 = sshll.u32 %s381_s12, 4  ;;  %s16_s13 = int_to_ptr.vmem [resolvable:$true] %s15_s13 }
   0x3   :  { %s345_s14 = scalar_lea.vmem %s16_s13, 256  ;;  %p350_p1 = scmp.lt.s32.totalorder %s16_s13, %s16_s13 }
   0x4   :  { %p346_p0 = scmp.ne.s32.totalorder %s16_s13, %s345_s14  ;;  %p351_p2 = scmp.lt.s32.totalorder %s345_s14, %s345_s14 }
   0x6   :  { %p352_p3 = por %p351_p2, %p350_p1 }
   0x8   :  { %p353_p4 = pnand %p352_p3, %p346_p0 }
   0xa   :  { %356 = shalt.err (!%p353_p4)
}
   0xb   :  { %s382_s15 = smov 128   ;;  %s383_s16 = smov 8  }
   0xc   :  { %21 = dma.hbm_to_vmem [thread:$0]  %s431_s0, 256, %s16_s13, [#allocation3], %s382_s15, %s382_s15, %s383_s16  }
   0xd   :  { %377 = dma.done.wait [#allocation3], 256  }
   0xe   :  { %378 = vsyncadd [#allocation3], 4294967040  ;;  %vm37_vm0 = vcmask 1043456   ;;  %v29_v0 = vld [vmem:[#allocation2] sm:$0xff]  ;;  %v30_v1 = vld [vmem:[#allocation2 + $0x8] sm:$0xff]  ;;  %v384_v17 = vmov 0.0   ;;  %v63_v18 = vlaneseq }
   0xf   :  { %v33_v2 = vcombine.high %v29_v0, %v29_v0  ;;  %v51_v3 = vsel %vm37_vm0, %v29_v0, -inf  ;;  %v38_v4 = vsel %vm37_vm0, %v29_v0, 0.0  ;;  %v34_v5 = vcombine.high %v30_v1, %v30_v1  ;;  %v91_v16 = vld [vmem:[%s432_s1] sm:$0xf]  ;;  %312 = vmatprep.subr.mxu0 %v384_v17  ;;  %317 = vmatprep.subr.mxu1 %v384_v17 }
  0x10   :  { %v56_v6 = vsel %vm37_vm0, %v30_v1, -inf  ;;  %v43_v7 = vsel %vm37_vm0, %v30_v1, 0.0  ;;  %vm385_vm1 = vmmov 0   ;;  %313 = vmatpush3.msk.msra.mxu0 %vm37_vm0, %v91_v16  ;;  %v64_v19 = vand.u32 127, %v63_v18  ;;  %v170_v35 = vld [vmem:[%s433_s2] sm:$0x3] }
  0x11   :  { %v52_v8 = vsel %vm37_vm0, %v33_v2, -inf  ;;  %v39_v9 = vsel %vm37_vm0, %v33_v2, 0.0  ;;  %v57_v10 = vsel %vm37_vm0, %v34_v5, -inf  ;;  %v44_v11 = vsel %vm37_vm0, %v34_v5, 0.0  ;;  %314 = vmatprep.mubr.msk.f32.mxu0 %vm385_vm1, %v384_v17  ;;  %319 = vmatprep.mubr.msk.f32.mxu1 %vm385_vm1, %v384_v17  ;;  %s387_s2 = smov [#allocation5]  }
  0x12   :  { %v53_v12 = vmax.f32 %v51_v3, %v52_v8  ;;  %v40_v13 = vadd.f32 %v39_v9, %v38_v4  ;;  %v58_v14 = vmax.f32 %v56_v6, %v57_v10  ;;  %v45_v15 = vadd.f32 %v44_v11, %v43_v7  ;;  %s291_s21 = sshll.u32 %s387_s2, 4  ;;  %s292_s21 = int_to_ptr.vmem [resolvable:$true] %s291_s21 }
  0x13   :  { %v66_v20 = vshrl.u32 %v63_v18, 7  ;;  %vm86_vm2 = vcmask 1043459   ;;  %vm73_vm3 = vcmask 1041409   ;;  %vm89_vm4 = vcmask 1041408   ;;  %s357_s22 = scalar_lea.vmem %s292_s21, 32  ;;  %p362_p6 = scmp.lt.s32.totalorder %s292_s21, %s292_s21 }
  0x14   :  { %54 = vmax.xlane.f32.xlu1 %v53_v12  ;;  %41 = vadd.xlane.f32.xlu0 %v40_v13  ;;  %vm92_vm5 = vcmask 31744   ;;  %vm171_vm6 = vcmask 15360   ;;  %v386_v46 = vmov 1966171168   ;;  %vm283_vm7 = vcmask 24576   ;;  %p358_p5 = scmp.ne.s32.totalorder %s292_s21, %s357_s22  ;;  %p363_p7 = scmp.lt.s32.totalorder %s357_s22, %s357_s22 }
  0x15   :  { %v67_v23 = vsub.s32 %v64_v19, %v66_v20  ;;  %318 = vmatpush3.msk.msra.mxu1 %vm89_vm4, %v170_v35  ;;  %v260_v47 = vunpack.c.l.s4 %v386_v46 }
  0x16   :  { %p364_p8 = por %p363_p7, %p362_p6 }
  0x17   :  { %v261_v48 = vunpack.c.0.s8 %v260_v47 }
  0x18   :  { %59 = vmax.xlane.f32.xlu1 %v58_v14  ;;  %46 = vadd.xlane.f32.xlu0 %v45_v15  ;;  %p365_p9 = pnand %p364_p8, %p358_p5 }
  0x19   :  { %v264_v49 = vsub.s32 %v261_v48, %v66_v20 }
  0x9d   :  { %v55_v21 = vpop.xlane.xlu1 %54  ;;  %v42_v22 = vpop.xlane.xlu0 %41 }
  0x9e   :  { %v49_v24 = vmul.f32 0.00390625, %v42_v22  ;;  %v81_v29 = vrot.slane %v55_v21, %v67_v23 }
  0xa0   :  { %v68_v30 = vrot.slane %v49_v24, %v67_v23 }
  0xa1   :  { %v60_v25 = vpop.xlane.xlu1 %59  ;;  %v47_v26 = vpop.xlane.xlu0 %46 }
  0xa2   :  { %v85_v27 = vrot.slane %v60_v25, %v67_v23  ;;  %v50_v28 = vmul.f32 0.00390625, %v47_v26 }
  0xa4   :  { %v72_v31 = vrot.slane %v50_v28, %v67_v23  ;;  %v87_v32 = vsel %vm86_vm2, %v85_v27, %v81_v29 }
  0xa6   :  { %v74_v33 = vsel %vm73_vm3, %v72_v31, %v68_v30 }
  0xa7   :  { %v90_v34 = vsel %vm89_vm4, %v74_v33, %v87_v32 }
  0xa8   :  { %315 = vmatmul.mubr.msk.f32.vlgmr.msra.gmra.mxu0 %vm92_vm5, %v90_v34 }
 0x168   :  { %v165_v36 = vpop.f32.mrf.mxu0 }
 0x169   :  { %v169_v37 = vmax.f32 %v165_v36, 0.0 }
 0x16a   :  { %v316_v38 = vpop.f32.mrf.mxu0 }
 0x16b   :  { %320 = vmatmul.mubr.msk.f32.vlgmr.msra.gmra.mxu1 %vm171_vm6, %v169_v37 }
 0x22b   :  { %v244_v39 = vpop.f32.mrf.mxu1 }
 0x22c   :  { %v249_v40 = vrot.slane %v244_v39, 2 }
 0x22d   :  { %v321_v41 = vpop.f32.mrf.mxu1 }
 0x22e   :  { %v251_v42 = vadd.f32 %v249_v40, %v244_v39 }
 0x230   :  { %v307_v43 = vmul.f32 -1.442695, %v251_v42 }
 0x232   :  { %333 = vpow2.f32 %v307_v43 }
 0x23f   :  { %v334_v44 = vpop.eup %333 }
 0x240   :  { %v255_v45 = vadd.f32 1.0, %v334_v44 }
 0x242   :  { %335 = vrcp.f32 %v255_v45 }
 0x24f   :  { %v336_v50 = vpop.eup %335 }
 0x250   :  { %v265_v51 = vrot.slane %v336_v50, %v264_v49 }
 0x252   :  { %v266_v52 = vcombine.high %v265_v51, %v265_v51  ;;  %v273_v53 = vrot.slane %v265_v51, %v264_v49 }
 0x254   :  { %v280_v54 = vrot.slane %v266_v52, %v264_v49  ;;  %284 = vst.msk [vmem:[#allocation5] sm:$0x1] %vm283_vm7, %v273_v53 }
 0x256   :  { %285 = vst.msk [vmem:[#allocation5 + $0x1] sm:$0x1] %vm283_vm7, %v280_v54 }
 0x257   :  { %368 = shalt.err (!%p365_p9)
}
 0x258   :  { %s388_s23 = smov 16   ;;  %s389_s24 = smov 1  }
 0x259   :  { %297 = dma.vmem_to_hbm [thread:$0]  %s292_s21, 32, %s434_s3, [#allocation4], %s388_s23, %s388_s23, %s389_s24  }
 0x25a   :  { %379 = dma.done.wait [#allocation4], 32  }
 0x25b   :  { %380 = vsyncadd [#allocation4], 4294967264 }
 0x25c   :  { %301 = vsyncpa [#allocation3], 1 }
 0x25d   :  { %302 = vsyncpa [#allocation4], 1 }

</bundles_post_ra>
